<compile_context>
chip_gen: v7x
topology: tpu7x:2x2x1
jax: 0.10.0
libtpu: 0.0.40
codegen_flags: <defaults>
</compile_context>

<pallas_src>
import functools

import jax
import jax.numpy as jnp
from jax.experimental import pallas as pl
from jax.experimental.pallas import tpu as pltpu

INPUT_SIZE = 63
HIDDEN_SIZE = 128
NUM_CLASSES = 10          # stand-in for len(gestures)

K_PAD = 64                # input features padded 63 -> 64
OUT_PAD = 128             # class lanes padded to a lane-dense 128-wide slab
TILE_B_MAX = 512          # batch tile (amortizes per-step overhead, fits VMEM easily)


def _round_up(n, m):
    return (n + m - 1) // m * m


def _gesture_kernel(x_ref, w1_ref, b1_ref, w2_ref, b2_ref, w34_ref, b34_ref,
                    o_ref, *, with_softmax, num_classes):
    # fc1 + ReLU (dropout is identity at inference). bf16 matmul, f32 accumulate.
    h = jnp.dot(x_ref[...], w1_ref[...], preferred_element_type=jnp.float32)
    h = jnp.maximum(h + b1_ref[...], 0.0)

    # fc2 + ReLU
    h = jnp.dot(h.astype(w2_ref.dtype), w2_ref[...],
                preferred_element_type=jnp.float32)
    h = jnp.maximum(h + b2_ref[...], 0.0)

    # fc3 and fc4 folded offline into a single (B,64)x(64,128) matmul
    logits = jnp.dot(h.astype(w34_ref.dtype), w34_ref[...],
                     preferred_element_type=jnp.float32)
    logits = logits + b34_ref[...]

    if with_softmax:
        # Mask padded class lanes so they cannot corrupt the softmax.
        lane = jax.lax.broadcasted_iota(jnp.int32, logits.shape, 1)
        masked = jnp.where(lane < num_classes, logits, jnp.float32(-1e30))
        m = jnp.max(masked, axis=1, keepdims=True)
        e = jnp.exp(masked - m)                      # padded lanes -> 0
        denom = jnp.sum(e, axis=1, keepdims=True)
        logits = e * pl.reciprocal(denom, approx=True)

    o_ref[...] = logits.astype(o_ref.dtype)


def prepare_params(params, compute_dtype=jnp.bfloat16):
    """Fold fc3/fc4, pad K 63->64 and classes ->128, pre-cast matmul weights."""
    w1, b1 = params["w1"], params["b1"]
    w2, b2 = params["w2"], params["b2"]
    w3, b3 = params["w3"], params["b3"]
    w4, b4 = params["w4"], params["b4"]

    num_classes = w4.shape[1]
    out_pad = max(OUT_PAD, _round_up(num_classes, 128))

    w34 = w3 @ w4                       # (64, C), folded in f32
    b34 = b3 @ w4 + b4                  # (1,  C)

    w1p = jnp.pad(w1, ((0, K_PAD - w1.shape[0]), (0, 0)))
    w34p = jnp.pad(w34, ((0, 0), (0, out_pad - num_classes)))
    b34p = jnp.pad(b34, ((0, 0), (0, out_pad - num_classes)))

    return {
        "w1": w1p.astype(compute_dtype),
        "b1": b1.astype(jnp.float32),
        "w2": w2.astype(compute_dtype),
        "b2": b2.astype(jnp.float32),
        "w34": w34p.astype(compute_dtype),
        "b34": b34p.astype(jnp.float32),
        "num_classes": num_classes,
    }


def gesture_model_forward(x, prep, with_softmax=False, tile_b_max=TILE_B_MAX):
    """x: (B, INPUT_SIZE) float32. prep: output of prepare_params."""
    B = x.shape[0]
    num_classes = prep["num_classes"]
    compute_dtype = prep["w1"].dtype
    k_pad = prep["w1"].shape[0]
    out_pad = prep["w34"].shape[1]

    tile_b = min(tile_b_max, _round_up(B, 8))
    b_pad = _round_up(B, tile_b)

    xp = jnp.pad(x, ((0, b_pad - B), (0, k_pad - x.shape[1]))).astype(compute_dtype)

    kernel = functools.partial(_gesture_kernel, with_softmax=with_softmax,
                               num_classes=num_classes)

    def resident(a):  # weights/biases stay VMEM-resident across batch tiles
        return pl.BlockSpec(a.shape, lambda i, nd=a.ndim: (0,) * nd)

    out = pl.pallas_call(
        kernel,
        out_shape=jax.ShapeDtypeStruct((b_pad, out_pad), jnp.float32),
        grid=(b_pad // tile_b,),
        in_specs=[
            pl.BlockSpec((tile_b, k_pad), lambda i: (i, 0)),
            resident(prep["w1"]), resident(prep["b1"]),
            resident(prep["w2"]), resident(prep["b2"]),
            resident(prep["w34"]), resident(prep["b34"]),
        ],
        out_specs=pl.BlockSpec((tile_b, out_pad), lambda i: (i, 0)),
        compiler_params=pltpu.CompilerParams(
            dimension_semantics=("parallel",),
            vmem_limit_bytes=32 * 1024 * 1024),
    )(xp, prep["w1"], prep["b1"], prep["w2"], prep["b2"],
      prep["w34"], prep["b34"])

    return out[:B, :num_classes]


def init_params(key):
    """Deterministic init mimicking nn.Linear's uniform(-1/sqrt(fan_in), 1/sqrt(fan_in))."""
    dims = [(INPUT_SIZE, HIDDEN_SIZE),
            (HIDDEN_SIZE, HIDDEN_SIZE // 2),
            (HIDDEN_SIZE // 2, HIDDEN_SIZE // 2),
            (HIDDEN_SIZE // 2, NUM_CLASSES)]
    params = {}
    keys = jax.random.split(key, 2 * len(dims))
    for i, (fin, fout) in enumerate(dims):
        bound = 1.0 / (fin ** 0.5)
        params[f"w{i+1}"] = jax.random.uniform(
            keys[2 * i], (fin, fout), jnp.float32, -bound, bound)
        params[f"b{i+1}"] = jax.random.uniform(
            keys[2 * i + 1], (1, fout), jnp.float32, -bound, bound)
    return params


def _reference_forward_prepared(x, prep, with_softmax=False):
    """Mirrors the kernel math exactly (folded fc3/fc4, bf16 matmul, f32 accumulate)."""
    cd = prep["w1"].dtype
    xp = jnp.pad(x, ((0, 0), (0, prep["w1"].shape[0] - x.shape[1]))).astype(cd)
    h = jnp.dot(xp, prep["w1"], preferred_element_type=jnp.float32) + prep["b1"]
    h = jnp.maximum(h, 0.0)
    h = jnp.dot(h.astype(cd), prep["w2"], preferred_element_type=jnp.float32) + prep["b2"]
    h = jnp.maximum(h, 0.0)
    logits = jnp.dot(h.astype(cd), prep["w34"],
                     preferred_element_type=jnp.float32) + prep["b34"]
    logits = logits[:, :prep["num_classes"]]
    if with_softmax:
        return jax.nn.softmax(logits, axis=1)
    return logits


def _reference_forward_f32(x, params, with_softmax=False):
    """Pure f32, un-fused reference (original PyTorch semantics)."""
    h = jnp.maximum(x @ params["w1"] + params["b1"], 0.0)
    h = jnp.maximum(h @ params["w2"] + params["b2"], 0.0)
    h = h @ params["w3"] + params["b3"]
    h = h @ params["w4"] + params["b4"]
    if with_softmax:
        h = jax.nn.softmax(h, axis=1)
    return h


if __name__ == "__main__":
    key = jax.random.PRNGKey(0)
    pkey, xkey, x2key = jax.random.split(key, 3)
    params = init_params(pkey)
    prep = prepare_params(params)

    # Small batch (single grid step).
    B = 8
    x = jax.random.normal(xkey, (B, INPUT_SIZE), jnp.float32)
    logits = gesture_model_forward(x, prep, with_softmax=False)
    probs = gesture_model_forward(x, prep, with_softmax=True)
    jax.block_until_ready((logits, probs))

    ref_logits = _reference_forward_prepared(x, prep, with_softmax=False)
    ref_probs = _reference_forward_prepared(x, prep, with_softmax=True)
    assert logits.shape == (B, NUM_CLASSES)
    assert probs.shape == (B, NUM_CLASSES)
    assert jnp.allclose(logits, ref_logits, atol=1e-4, rtol=1e-4)
    assert jnp.allclose(probs, ref_probs, atol=2e-3, rtol=2e-3)

    # Sanity check against the original (un-folded, pure f32) semantics.
    f32_logits = _reference_forward_f32(x, params, with_softmax=False)
    f32_probs = _reference_forward_f32(x, params, with_softmax=True)
    assert jnp.allclose(logits, f32_logits, atol=5e-2, rtol=5e-2)
    assert jnp.allclose(probs, f32_probs, atol=5e-2, rtol=5e-2)

    # Exercise batch padding + multi-step "parallel" grid with a small tile size.
    B2 = 200
    x2 = jax.random.normal(x2key, (B2, INPUT_SIZE), jnp.float32)
    logits2 = gesture_model_forward(x2, prep, with_softmax=False, tile_b_max=64)
    probs2 = gesture_model_forward(x2, prep, with_softmax=True, tile_b_max=64)
    jax.block_until_ready((logits2, probs2))
    assert logits2.shape == (B2, NUM_CLASSES)
    assert jnp.allclose(logits2, _reference_forward_prepared(x2, prep, False),
                        atol=1e-4, rtol=1e-4)
    assert jnp.allclose(probs2, _reference_forward_prepared(x2, prep, True),
                        atol=2e-3, rtol=2e-3)

    print("KERNEL_OK")
</pallas_src>

<mosaic_0001>
module attributes {stable_mosaic.version = 11 : i64} {
  func.func @_gesture_kernel(%arg0: i32, %arg1: memref<8x64xbf16, #tpu.memory_space<vmem>>, %arg2: memref<64x128xbf16, #tpu.memory_space<vmem>>, %arg3: memref<1x128xf32, #tpu.memory_space<vmem>>, %arg4: memref<128x64xbf16, #tpu.memory_space<vmem>>, %arg5: memref<1x64xf32, #tpu.memory_space<vmem>>, %arg6: memref<64x128xbf16, #tpu.memory_space<vmem>>, %arg7: memref<1x128xf32, #tpu.memory_space<vmem>>, %arg8: memref<8x128xf32, #tpu.memory_space<vmem>>) attributes {dimension_semantics = [#tpu.dimension_semantics<parallel>], iteration_bounds = array<i64: 1>, scalar_prefetch = 0 : i64, scratch_operands = 0 : i64, tpu.core_type = #tpu.core_type<tc>, window_params = [{transform_indices = @transform_0, window_bounds = array<i64: 8, 64>}, {pipeline_mode = #tpu.pipeline_mode<synchronous>, transform_indices = @transform_1, window_bounds = array<i64: 64, 128>}, {pipeline_mode = #tpu.pipeline_mode<synchronous>, transform_indices = @transform_2, window_bounds = array<i64: 1, 128>}, {pipeline_mode = #tpu.pipeline_mode<synchronous>, transform_indices = @transform_3, window_bounds = array<i64: 128, 64>}, {pipeline_mode = #tpu.pipeline_mode<synchronous>, transform_indices = @transform_4, window_bounds = array<i64: 1, 64>}, {pipeline_mode = #tpu.pipeline_mode<synchronous>, transform_indices = @transform_5, window_bounds = array<i64: 64, 128>}, {pipeline_mode = #tpu.pipeline_mode<synchronous>, transform_indices = @transform_6, window_bounds = array<i64: 1, 128>}, {transform_indices = @transform_7, window_bounds = array<i64: 8, 128>}]} {
    %c0 = arith.constant 0 : index
    %c0_0 = arith.constant 0 : index
    %0 = vector.load %arg1[%c0, %c0_0] : memref<8x64xbf16, #tpu.memory_space<vmem>>, vector<8x64xbf16>
    %c0_1 = arith.constant 0 : index
    %c0_2 = arith.constant 0 : index
    %1 = vector.load %arg2[%c0_1, %c0_2] : memref<64x128xbf16, #tpu.memory_space<vmem>>, vector<64x128xbf16>
    %cst = arith.constant dense<0.000000e+00> : vector<8x128xf32>
    %2 = tpu.matmul %0, %1, %cst {dimension_numbers = #tpu.dot_dimension_numbers<[1], [0], [0], [1], [0, 0, 1, 1], [], []>} : vector<8x64xbf16>, vector<64x128xbf16>, vector<8x128xf32> -> vector<8x128xf32>
    %c0_3 = arith.constant 0 : index
    %c0_4 = arith.constant 0 : index
    %3 = vector.load %arg3[%c0_3, %c0_4] : memref<1x128xf32, #tpu.memory_space<vmem>>, vector<1x128xf32>
    %4 = vector.broadcast %3 : vector<1x128xf32> to vector<8x128xf32>
    %5 = arith.addf %2, %4 : vector<8x128xf32>
    %cst_5 = arith.constant 0.000000e+00 : f32
    %6 = vector.broadcast %cst_5 : f32 to vector<8x128xf32>
    %7 = arith.maximumf %5, %6 : vector<8x128xf32>
    %8 = arith.truncf %7 : vector<8x128xf32> to vector<8x128xbf16>
    %c0_6 = arith.constant 0 : index
    %c0_7 = arith.constant 0 : index
    %9 = vector.load %arg4[%c0_6, %c0_7] : memref<128x64xbf16, #tpu.memory_space<vmem>>, vector<128x64xbf16>
    %cst_8 = arith.constant dense<0.000000e+00> : vector<8x64xf32>
    %10 = tpu.matmul %8, %9, %cst_8 {dimension_numbers = #tpu.dot_dimension_numbers<[1], [0], [0], [1], [0, 0, 1, 1], [], []>} : vector<8x128xbf16>, vector<128x64xbf16>, vector<8x64xf32> -> vector<8x64xf32>
    %c0_9 = arith.constant 0 : index
    %c0_10 = arith.constant 0 : index
    %11 = vector.load %arg5[%c0_9, %c0_10] : memref<1x64xf32, #tpu.memory_space<vmem>>, vector<1x64xf32>
    %12 = vector.broadcast %11 : vector<1x64xf32> to vector<8x64xf32>
    %13 = arith.addf %10, %12 : vector<8x64xf32>
    %cst_11 = arith.constant 0.000000e+00 : f32
    %14 = vector.broadcast %cst_11 : f32 to vector<8x64xf32>
    %15 = arith.maximumf %13, %14 : vector<8x64xf32>
    %16 = arith.truncf %15 : vector<8x64xf32> to vector<8x64xbf16>
    %c0_12 = arith.constant 0 : index
    %c0_13 = arith.constant 0 : index
    %17 = vector.load %arg6[%c0_12, %c0_13] : memref<64x128xbf16, #tpu.memory_space<vmem>>, vector<64x128xbf16>
    %cst_14 = arith.constant dense<0.000000e+00> : vector<8x128xf32>
    %18 = tpu.matmul %16, %17, %cst_14 {dimension_numbers = #tpu.dot_dimension_numbers<[1], [0], [0], [1], [0, 0, 1, 1], [], []>} : vector<8x64xbf16>, vector<64x128xbf16>, vector<8x128xf32> -> vector<8x128xf32>
    %c0_15 = arith.constant 0 : index
    %c0_16 = arith.constant 0 : index
    %19 = vector.load %arg7[%c0_15, %c0_16] : memref<1x128xf32, #tpu.memory_space<vmem>>, vector<1x128xf32>
    %20 = vector.broadcast %19 : vector<1x128xf32> to vector<8x128xf32>
    %21 = arith.addf %18, %20 : vector<8x128xf32>
    %c0_17 = arith.constant 0 : index
    %c0_18 = arith.constant 0 : index
    %22 = vector.load %arg8[%c0_17, %c0_18] : memref<8x128xf32, #tpu.memory_space<vmem>>, vector<8x128xf32>
    tpu.vector_store %arg8[%c0_17, %c0_18], %21 {strides = array<i32>} : memref<8x128xf32, #tpu.memory_space<vmem>>, vector<8x128xf32>,
    return
  }
  func.func @transform_0(%arg0: i32) -> (i32, i32) {
    %c0_i32 = arith.constant 0 : i32
    %c0_i32_0 = arith.constant 0 : i32
    return %arg0, %c0_i32 : i32, i32
  }
  func.func @transform_1(%arg0: i32) -> (i32, i32) {
    %c0_i32 = arith.constant 0 : i32
    %c0_i32_0 = arith.constant 0 : i32
    %c0_i32_1 = arith.constant 0 : i32
    return %c0_i32, %c0_i32_0 : i32, i32
  }
  func.func @transform_2(%arg0: i32) -> (i32, i32) {
    %c0_i32 = arith.constant 0 : i32
    %c0_i32_0 = arith.constant 0 : i32
    %c0_i32_1 = arith.constant 0 : i32
    return %c0_i32, %c0_i32_0 : i32, i32
  }
  func.func @transform_3(%arg0: i32) -> (i32, i32) {
    %c0_i32 = arith.constant 0 : i32
    %c0_i32_0 = arith.constant 0 : i32
    %c0_i32_1 = arith.constant 0 : i32
    return %c0_i32, %c0_i32_0 : i32, i32
  }
  func.func @transform_4(%arg0: i32) -> (i32, i32) {
    %c0_i32 = arith.constant 0 : i32
    %c0_i32_0 = arith.constant 0 : i32
    %c0_i32_1 = arith.constant 0 : i32
    return %c0_i32, %c0_i32_0 : i32, i32
  }
  func.func @transform_5(%arg0: i32) -> (i32, i32) {
    %c0_i32 = arith.constant 0 : i32
    %c0_i32_0 = arith.constant 0 : i32
    %c0_i32_1 = arith.constant 0 : i32
    return %c0_i32, %c0_i32_0 : i32, i32
  }
  func.func @transform_6(%arg0: i32) -> (i32, i32) {
    %c0_i32 = arith.constant 0 : i32
    %c0_i32_0 = arith.constant 0 : i32
    %c0_i32_1 = arith.constant 0 : i32
    return %c0_i32, %c0_i32_0 : i32, i32
  }
  func.func @transform_7(%arg0: i32) -> (i32, i32) {
    %c0_i32 = arith.constant 0 : i32
    %c0_i32_0 = arith.constant 0 : i32
    return %arg0, %c0_i32 : i32, i32
  }
}

</mosaic_0001>

<bundles_post_ra>
// kernel: tpu_custom_call.1
= control target key start
LH: loop header
LB: loop body
LE: loop exit
PB: predicated region body
PF: predicated region fallthrough
CT: control target
= control target key end

     0   :  { %v451_v1 = vmov 0.0   ;;  %vm452_vm0 = vmmov 0   ;;  %vm68_vm1 = vcmask 523264   ;;  %s571_s0 = inlined_call_operand.vmem [shape: bf16[8,64], index: 0, kind: input, shape index: {}]   ;;  %s572_s1 = inlined_call_operand.vmem [shape: bf16[64,128], index: 1, kind: input, shape index: {}]   ;;  %s573_s2 = inlined_call_operand.vmem [shape: f32[1,128], index: 2, kind: input, shape index: {}]   ;;  %s574_s3 = inlined_call_operand.vmem [shape: bf16[128,64], index: 3, kind: input, shape index: {}]   ;;  %s575_s4 = inlined_call_operand.vmem [shape: f32[1,64], index: 4, kind: input, shape index: {}]   ;;  %s576_s5 = inlined_call_operand.vmem [shape: bf16[64,128], index: 5, kind: input, shape index: {}]   ;;  %s577_s6 = inlined_call_operand.vmem [shape: f32[1,128], index: 6, kind: input, shape index: {}]   ;;  %s578_s7 = inlined_call_operand.hbm [shape: f32[8,128], index: 7, kind: output, shape index: {}]  }
   0x1   :  { %v411_v0 = vld [vmem:[%s572_s1] sm:$0xff]   ;;  %364 = vmatprep.subr.bf16.mxu0 %v451_v1  ;;  %376 = vmatprep.subr.bf16.mxu1 %v451_v1  ;;  %v412_v2 = vld [vmem:[%s572_s1 + $0x8] sm:$0xff]   ;;  %v413_v4 = vld [vmem:[%s572_s1 + $0x10] sm:$0xff]  }
   0x2   :  { %365 = vmatpush3.bf16.msra.mxu0 %v411_v0  ;;  %372 = vmatprep.mubr.msk.bf16.mxu0 %vm452_vm0, %v451_v1  ;;  %v415_v3 = vld [vmem:[%s574_s3] sm:$0xff]   ;;  %v416_v5 = vld [vmem:[%s574_s3 + $0x8] sm:$0xff]   ;;  %v414_v6 = vld [vmem:[%s572_s1 + $0x18] sm:$0xff]  }
   0x3   :  { %366 = vmatprep.subr.bf16.mxu0 %v451_v1  ;;  %392 = vmatprep.mubr.msk.bf16.mxu1 %vm452_vm0, %v451_v1  ;;  %v417_v7 = vld [vmem:[%s574_s3 + $0x10] sm:$0xff]   ;;  %v28_v8 = vld [vmem:[%s571_s0] sm:$0xf] }
   0x4   :  { %377 = vmatpush3.bf16.msra.mxu1 %v415_v3 }
   0x5   :  { %378 = vmatprep.subr.bf16.mxu1 %v451_v1 }
   0x6   :  { %367 = vmatpush3.bf16.msra.mxu0 %v412_v2 }
   0x7   :  { %368 = vmatprep.subr.bf16.mxu0 %v451_v1 }
   0x8   :  { %379 = vmatpush3.bf16.msra.mxu1 %v416_v5 }
   0x9   :  { %380 = vmatprep.subr.bf16.mxu1 %v451_v1 }
   0xa   :  { %369 = vmatpush3.bf16.msra.mxu0 %v413_v4 }
   0xb   :  { %370 = vmatprep.subr.bf16.mxu0 %v451_v1 }
   0xe   :  { %371 = vmatpush3.bf16.msra.mxu0 %v414_v6 }
   0xf   :  { %12 = vsyncpa [#allocation3], 0  ;;  %381 = vmatpush3.bf16.msra.mxu1 %v417_v7  ;;  %v418_v9 = vld [vmem:[%s574_s3 + $0x18] sm:$0xff]   ;;  %396 = vmatprep.subr.bf16.mxu0 %v451_v1  ;;  %v419_v10 = vld [vmem:[%s574_s3 + $0x20] sm:$0xff]   ;;  %s453_s14 = smov [#allocation2]  }
  0x10   :  { %382 = vmatprep.subr.bf16.mxu1 %v451_v1  ;;  %v420_v11 = vld [vmem:[%s574_s3 + $0x28] sm:$0xff]   ;;  %v421_v12 = vld [vmem:[%s574_s3 + $0x30] sm:$0xff]   ;;  %v422_v13 = vld [vmem:[%s574_s3 + $0x38] sm:$0xff]  }
  0x11   :  { %373 = vmatmul.mubr.msk.bf16.vlgmr.msra.gmra.mrb[0].mxu0 %vm68_vm1, %v28_v8  ;;  %v423_v14 = vld [vmem:[%s576_s5] sm:$0xff]   ;;  %v424_v15 = vld [vmem:[%s576_s5 + $0x8] sm:$0xff]   ;;  %v425_v24 = vld [vmem:[%s576_s5 + $0x10] sm:$0xff]  }
  0x12   :  { %404 = vmatprep.mubr.msk.bf16.mxu0 %vm452_vm0, %v451_v1  ;;  %397 = vmatpush3.bf16.msra.mxu0 %v423_v14  ;;  %v324_v16 = vld [vmem:[%s573_s2] ss:$0 sm:$0xff]  ;;  %v426_v25 = vld [vmem:[%s576_s5 + $0x18] sm:$0xff]   ;;  %s316_s5 = sshll.u32 %s453_s14, 4  ;;  %s317_s5 = int_to_ptr.vmem [resolvable:$true] %s316_s5 }
  0x13   :  { %383 = vmatpush3.bf16.msra.mxu1 %v418_v9  ;;  %398 = vmatprep.subr.bf16.mxu0 %v451_v1  ;;  %v330_v26 = vld [vmem:[%s575_s4] ss:$0 sm:$0xff]  ;;  %s427_s4 = scalar_lea.vmem %s317_s5, 128  ;;  %p432_p1 = scmp.lt.s32.totalorder %s317_s5, %s317_s5 }
  0x14   :  { %384 = vmatprep.subr.bf16.mxu1 %v451_v1  ;;  %v339_v34 = vld [vmem:[%s577_s6] ss:$0 sm:$0xff]  ;;  %p428_p0 = scmp.ne.s32.totalorder %s317_s5, %s427_s4  ;;  %p433_p2 = scmp.lt.s32.totalorder %s427_s4, %s427_s4 }
  0x16   :  { %399 = vmatpush3.bf16.msra.mxu0 %v424_v15  ;;  %p434_p3 = por %p433_p2, %p432_p1 }
  0x17   :  { %385 = vmatpush3.bf16.msra.mxu1 %v419_v10  ;;  %400 = vmatprep.subr.bf16.mxu0 %v451_v1 }
  0x18   :  { %386 = vmatprep.subr.bf16.mxu1 %v451_v1  ;;  %p435_p4 = pnand %p434_p3, %p428_p0 }
  0x1a   :  { %401 = vmatpush3.bf16.msra.mxu0 %v425_v24 }
  0x1b   :  { %387 = vmatpush3.bf16.msra.mxu1 %v420_v11  ;;  %402 = vmatprep.subr.bf16.mxu0 %v451_v1 }
  0x1c   :  { %388 = vmatprep.subr.bf16.mxu1 %v451_v1 }
  0x1e   :  { %403 = vmatpush3.bf16.msra.mxu0 %v426_v25 }
  0x1f   :  { %389 = vmatpush3.bf16.msra.mxu1 %v421_v12 }
  0x20   :  { %390 = vmatprep.subr.bf16.mxu1 %v451_v1 }
  0x23   :  { %391 = vmatpush3.bf16.msra.mxu1 %v422_v13 }
  0xe4   :  { %v106_v17 = vpop.f32.mrb[0].mxu0 }
  0xe5   :  { %v107_v18 = vadd.f32 %v324_v16, %v106_v17  ;;  %v374_v19 = vpop.f32.mrb[1].mxu0 }
  0xe6   :  { %v109_v20 = vpop.f32.mrb[2].mxu0 }
  0xe7   :  { %v112_v21 = vmax.f32 %v107_v18, 0.0  ;;  %v375_v22 = vpop.f32.mrb[3].mxu0 }
  0xe9   :  { %v113_v23 = vpack.c.bf16 %v112_v21, %v112_v21 }
  0xeb   :  { %393 = vmatmul.mubr.bf16.vlgmr.msra.gmra.mrb[0].mxu1 %v113_v23 }
 0x1be   :  { %v219_v27 = vpop.f32.mrb[0].mxu1 }
 0x1bf   :  { %v220_v28 = vadd.f32 %v330_v26, %v219_v27  ;;  %v394_v29 = vpop.f32.mrb[1].mxu1 }
 0x1c0   :  { %v222_v30 = vpop.f32.mrb[2].mxu1 }
 0x1c1   :  { %v225_v31 = vmax.f32 %v220_v28, 0.0  ;;  %v395_v32 = vpop.f32.mrb[3].mxu1 }
 0x1c3   :  { %v226_v33 = vpack.c.bf16 %v225_v31, %v225_v31 }
 0x1c5   :  { %405 = vmatmul.mubr.msk.bf16.vlgmr.msra.gmra.mrb[4].mxu0 %vm68_vm1, %v226_v33 }
 0x298   :  { %v303_v35 = vpop.f32.mrb[4].mxu0 }
 0x299   :  { %v304_v36 = vadd.f32 %v339_v34, %v303_v35  ;;  %v406_v37 = vpop.f32.mrb[5].mxu0 }
 0x29a   :  { %v306_v38 = vpop.f32.mrb[6].mxu0 }
 0x29b   :  { %309 = vst [vmem:[#allocation2] sm:$0xff] %v304_v36  ;;  %v407_v39 = vpop.f32.mrb[7].mxu0 }
 0x29c   :  { %438 = shalt.err (!%p435_p4)
}
 0x29d   :  { %s439_s6 = scalar_lea.hbm %s578_s7, 128 }
 0x29e   :  { %p440_p5 = scmp.ne.s32.totalorder %s578_s7, %s439_s6  ;;  %p443_p6 = scmp.lt.u32.totalorder %s439_s6, %s578_s7 }
 0x2a0   :  { %p445_p7 = pnand %p443_p6, %p440_p5 }
 0x2a2   :  { %448 = shalt.err (!%p445_p7)
}
 0x2a3   :  { %319 = dma.vmem_to_hbm [thread:$0]  %s317_s5, 128, %s578_s7, [#allocation3]  }
 0x2a4   :  { %449 = dma.done.wait [#allocation3], 128  }
 0x2a5   :  { %450 = vsyncadd [#allocation3], 4294967168 }
 0x2a6   :  { %323 = vsyncpa [#allocation3], 1 }

</bundles_post_ra>
